<compile_context>
chip_gen: v5e
topology: v5e:2x2
jax: 0.10.0
libtpu: 0.0.40
codegen_flags: <defaults>
</compile_context>

<pallas_src>
import jax
import jax.numpy as jnp
from jax import lax
from jax.experimental import pallas as pl
from jax.experimental.pallas import tpu as pltpu


def _fused_linear_kernel(x_ref, w_ref, b_ref, o_ref, acc_ref):
    # x_ref  : (tm, tk)  row tile of [x | alpha * x @ B^T]   (compute dtype)
    # w_ref  : (tn, tk)  out_features tile of [W | lora_A]   (compute dtype)
    # b_ref  : (1,  tn)  bias tile                           (f32)
    # o_ref  : (tm, tn)  output tile
    # acc_ref: (tm, tn)  f32 accumulator scratch
    k = pl.program_id(2)

    @pl.when(k == 0)
    def _():
        # Fold bias into the accumulator at init -> epilogue is just a cast.
        acc_ref[...] = jnp.broadcast_to(b_ref[...], acc_ref.shape)

    # Contract last dim of lhs against last dim of rhs (x @ M^T) with no
    # materialized transpose; f32 accumulation on the MXU.
    nt = (((1,), (1,)), ((), ()))
    acc_ref[...] += lax.dot_general(x_ref[...], w_ref[...], nt,
                                    preferred_element_type=jnp.float32)

    @pl.when(k == pl.num_programs(2) - 1)
    def _():
        o_ref[...] = acc_ref[...].astype(o_ref.dtype)


def _round_up(v, m):
    return pl.cdiv(v, m) * m


def lora_linear(x, w, b, lora_A, lora_B, *, alpha=16.0,
                tm=256, tn=256, tk=512,
                compute_dtype=jnp.bfloat16, out_dtype=jnp.float32,
                vmem_limit_bytes=None):
    """Forward of LoRALinear: x @ W^T + b + alpha * x @ (lora_A @ lora_B)^T.

    x: (M, in_f), w: (out_f, in_f), b: (out_f,),
    lora_A: (out_f, r), lora_B: (r, in_f).  Returns (M, out_f) out_dtype.
    """
    M, in_f = x.shape
    out_f = w.shape[0]
    r = lora_A.shape[1]
    k_total = in_f + r

    # Tiny low-rank projection with alpha folded in (applied once to (M, r)).
    xb = alpha * (x.astype(jnp.float32) @ lora_B.astype(jnp.float32).T)      # (M, r)

    # Fuse the LoRA path into the base matmul along K:
    #   [x | alpha*x@B^T] @ [W | A]^T == x @ W^T + alpha * x @ (A @ B)^T
    x_aug = jnp.concatenate([x.astype(jnp.float32), xb], axis=1)             # (M, K)
    w_aug = jnp.concatenate([w.astype(jnp.float32),
                             lora_A.astype(jnp.float32)], axis=1)            # (out_f, K)

    # Clamp tiles for small problems; keep (8, 128) alignment on the last dims.
    tm = min(tm, _round_up(M, 8))
    tn = min(tn, _round_up(out_f, 128))
    tk = min(tk, _round_up(k_total, 128))

    m_pad = _round_up(M, tm)
    n_pad = _round_up(out_f, tn)
    k_pad = _round_up(k_total, tk)

    # Zero padding contributes nothing to the dot; padded rows/cols sliced off.
    xp = jnp.pad(x_aug, ((0, m_pad - M), (0, k_pad - k_total))).astype(compute_dtype)
    wp = jnp.pad(w_aug, ((0, n_pad - out_f), (0, k_pad - k_total))).astype(compute_dtype)
    bp = jnp.pad(b.astype(jnp.float32), ((0, n_pad - out_f),)).reshape(1, n_pad)

    grid = (m_pad // tm, n_pad // tn, k_pad // tk)

    out = pl.pallas_call(
        _fused_linear_kernel,
        out_shape=jax.ShapeDtypeStruct((m_pad, n_pad), out_dtype),
        grid_spec=pltpu.PrefetchScalarGridSpec(
            num_scalar_prefetch=0,
            grid=grid,
            in_specs=[
                pl.BlockSpec((tm, tk), lambda i, j, k: (i, k)),   # [x | xb] tile
                pl.BlockSpec((tn, tk), lambda i, j, k: (j, k)),   # [W | A] tile
                pl.BlockSpec((1, tn), lambda i, j, k: (0, j)),    # bias tile
            ],
            out_specs=pl.BlockSpec((tm, tn), lambda i, j, k: (i, j)),
            scratch_shapes=[pltpu.VMEM((tm, tn), jnp.float32)],
        ),
        compiler_params=pltpu.CompilerParams(
            dimension_semantics=("parallel", "parallel", "arbitrary"),
            vmem_limit_bytes=vmem_limit_bytes,
        ),
    )(xp, wp, bp)

    return out[:M, :out_f]


if __name__ == "__main__":
    # Small shapes consistent with the module: Linear(in=32, out=64), r=8, alpha=16.
    M, in_f, out_f, r = 16, 32, 64, 8
    alpha = 16.0

    key = jax.random.PRNGKey(0)
    kx, kw, kb, ka, kbb = jax.random.split(key, 5)

    x = jax.random.normal(kx, (M, in_f), dtype=jnp.float32)

    # orig_linear parameters (deterministic synthetic init).
    w = jax.random.normal(kw, (out_f, in_f), dtype=jnp.float32) * 0.1
    b = jax.random.normal(kb, (out_f,), dtype=jnp.float32) * 0.1

    # LoRA params: A ~ normal (as in __init__); B given a small nonzero value so
    # the LoRA path is exercised numerically (module inits it to zeros).
    lora_A = jax.random.normal(ka, (out_f, r), dtype=jnp.float32)
    lora_B = 0.01 * jax.random.normal(kbb, (r, in_f), dtype=jnp.float32)

    # Plain-JAX reference, same op order as the PyTorch forward.
    ref = x @ w.T + b + alpha * (x @ (lora_A @ lora_B).T)

    # 1) Exact-math check: f32 compute path, tight tolerance.
    out_f32 = jax.block_until_ready(
        lora_linear(x, w, b, lora_A, lora_B, alpha=alpha,
                    compute_dtype=jnp.float32))
    assert out_f32.shape == (M, out_f)
    assert jnp.allclose(out_f32, ref, atol=1e-4, rtol=1e-4), "f32 mismatch vs reference"

    # 2) Optimized default: bf16 MXU operands, f32 accumulation -> loose tolerance.
    out_bf16 = jax.block_until_ready(
        lora_linear(x, w, b, lora_A, lora_B, alpha=alpha))
    assert jnp.allclose(out_bf16, ref, atol=5e-2, rtol=5e-2), "bf16 mismatch vs reference"

    print("KERNEL_OK")
</pallas_src>

<mosaic_0001>
module attributes {stable_mosaic.version = 11 : i64} {
  func.func @_fused_linear_kernel(%arg0: i32, %arg1: i32, %arg2: i32, %arg3: memref<16x128xf32, #tpu.memory_space<vmem>>, %arg4: memref<128x128xf32, #tpu.memory_space<vmem>>, %arg5: memref<1x128xf32, #tpu.memory_space<vmem>>, %arg6: memref<16x128xf32, #tpu.memory_space<vmem>>, %arg7: memref<16x128xf32, #tpu.memory_space<vmem>>) attributes {dimension_semantics = [#tpu.dimension_semantics<parallel>, #tpu.dimension_semantics<parallel>, #tpu.dimension_semantics<arbitrary>], iteration_bounds = array<i64: 1, 1, 1>, scalar_prefetch = 0 : i64, scratch_operands = 1 : i64, tpu.core_type = #tpu.core_type<tc>, window_params = [{transform_indices = @transform_0, window_bounds = array<i64: 16, 128>}, {transform_indices = @transform_1, window_bounds = array<i64: 128, 128>}, {transform_indices = @transform_2, window_bounds = array<i64: 1, 128>}, {transform_indices = @transform_3, window_bounds = array<i64: 16, 128>}]} {
    %c0_i32 = arith.constant 0 : i32
    %0 = arith.cmpi eq, %arg2, %c0_i32 : i32
    %1 = arith.extui %0 : i1 to i32
    %c0_i32_0 = arith.constant 0 : i32
    %2 = arith.cmpi ne, %1, %c0_i32_0 : i32
    scf.if %2 {
      %c0_10 = arith.constant 0 : index
      %c0_11 = arith.constant 0 : index
      %12 = vector.load %arg5[%c0_10, %c0_11] : memref<1x128xf32, #tpu.memory_space<vmem>>, vector<1x128xf32>
      %13 = vector.shape_cast %12 : vector<1x128xf32> to vector<1x128xf32>
      %14 = vector.broadcast %13 : vector<1x128xf32> to vector<16x128xf32>
      %c0_12 = arith.constant 0 : index
      %c0_13 = arith.constant 0 : index
      %15 = vector.load %arg7[%c0_12, %c0_13] : memref<16x128xf32, #tpu.memory_space<vmem>>, vector<16x128xf32>
      tpu.vector_store %arg7[%c0_12, %c0_13], %14 {strides = array<i32>} : memref<16x128xf32, #tpu.memory_space<vmem>>, vector<16x128xf32>,
    } else {
    }
    %c0 = arith.constant 0 : index
    %c0_1 = arith.constant 0 : index
    %3 = vector.load %arg7[%c0, %c0_1] : memref<16x128xf32, #tpu.memory_space<vmem>>, vector<16x128xf32>
    %c0_2 = arith.constant 0 : index
    %c0_3 = arith.constant 0 : index
    %4 = vector.load %arg3[%c0_2, %c0_3] : memref<16x128xf32, #tpu.memory_space<vmem>>, vector<16x128xf32>
    %c0_4 = arith.constant 0 : index
    %c0_5 = arith.constant 0 : index
    %5 = vector.load %arg4[%c0_4, %c0_5] : memref<128x128xf32, #tpu.memory_space<vmem>>, vector<128x128xf32>
    %cst = arith.constant dense<0.000000e+00> : vector<16x128xf32>
    %6 = tpu.matmul %4, %5, %cst {dimension_numbers = #tpu.dot_dimension_numbers<[1], [1], [0], [0], [0, 0, 1, 0], [], []>} : vector<16x128xf32>, vector<128x128xf32>, vector<16x128xf32> -> vector<16x128xf32>
    %7 = arith.addf %3, %6 : vector<16x128xf32>
    %c0_6 = arith.constant 0 : index
    %c0_7 = arith.constant 0 : index
    %8 = vector.load %arg7[%c0_6, %c0_7] : memref<16x128xf32, #tpu.memory_space<vmem>>, vector<16x128xf32>
    tpu.vector_store %arg7[%c0_6, %c0_7], %7 {strides = array<i32>} : memref<16x128xf32, #tpu.memory_space<vmem>>, vector<16x128xf32>,
    %c0_i32_8 = arith.constant 0 : i32
    %9 = arith.cmpi eq, %arg2, %c0_i32_8 : i32
    %10 = arith.extui %9 : i1 to i32
    %c0_i32_9 = arith.constant 0 : i32
    %11 = arith.cmpi ne, %10, %c0_i32_9 : i32
    scf.if %11 {
      %c0_10 = arith.constant 0 : index
      %c0_11 = arith.constant 0 : index
      %12 = vector.load %arg7[%c0_10, %c0_11] : memref<16x128xf32, #tpu.memory_space<vmem>>, vector<16x128xf32>
      %c0_12 = arith.constant 0 : index
      %c0_13 = arith.constant 0 : index
      %13 = vector.load %arg6[%c0_12, %c0_13] : memref<16x128xf32, #tpu.memory_space<vmem>>, vector<16x128xf32>
      tpu.vector_store %arg6[%c0_12, %c0_13], %12 {strides = array<i32>} : memref<16x128xf32, #tpu.memory_space<vmem>>, vector<16x128xf32>,
    } else {
    }
    return
  }
  func.func @transform_0(%arg0: i32, %arg1: i32, %arg2: i32) -> (i32, i32) {
    %c0_i32 = arith.constant 0 : i32
    return %arg0, %arg2 : i32, i32
  }
  func.func @transform_1(%arg0: i32, %arg1: i32, %arg2: i32) -> (i32, i32) {
    %c0_i32 = arith.constant 0 : i32
    return %arg1, %arg2 : i32, i32
  }
  func.func @transform_2(%arg0: i32, %arg1: i32, %arg2: i32) -> (i32, i32) {
    %c0_i32 = arith.constant 0 : i32
    %c0_i32_0 = arith.constant 0 : i32
    return %c0_i32, %arg1 : i32, i32
  }
  func.func @transform_3(%arg0: i32, %arg1: i32, %arg2: i32) -> (i32, i32) {
    %c0_i32 = arith.constant 0 : i32
    return %arg0, %arg1 : i32, i32
  }
}

</mosaic_0001>

<bundles_post_ra>
// kernel: tpu_custom_call.1
= control target key start
LH: loop header
LB: loop body
LE: loop exit
PB: predicated region body
PF: predicated region fallthrough
CT: control target
= control target key end

     0   :  { %8 = vsyncpa [#allocation4], 0  ;;  %s277_s0 = inlined_call_operand.hbm [shape: f32[16,128], index: 0, kind: input, shape index: {}]   ;;  %s278_s1 = inlined_call_operand.hbm [shape: f32[128,128], index: 1, kind: input, shape index: {}]   ;;  %s279_s2 = inlined_call_operand.vmem [shape: f32[1,128], index: 2, kind: input, shape index: {}]   ;;  %s280_s3 = inlined_call_operand.hbm [shape: f32[16,128], index: 3, kind: output, shape index: {}]  }
   0x1   :  { %9 = vsyncpa [#allocation7], 0 }
   0x2   :  { %10 = vsyncpa [#allocation5], 0  ;;  %s15_s14 = sshll.u32 %s277_s0, 4  ;;  %s231_s15 = smov [#allocation3]   ;;  %s16_s14 = int_to_ptr.hbm [resolvable:$true] %s15_s14 }
   0x3   :  { %s17_s16 = sshll.u32 %s231_s15, 4  ;;  %s28_s19 = sshll.u32 %s278_s1, 4  ;;  %s18_s16 = int_to_ptr.vmem [resolvable:$true] %s17_s16  ;;  %s29_s19 = int_to_ptr.hbm [resolvable:$true] %s28_s19 }
   0x4   :  { %s232_s20 = smov 128   ;;  %s233_s21 = smov 8  }
   0x5   :  { %23 = dma.hbm_to_vmem [thread:$0]  %s16_s14, 256, %s18_s16, [#allocation4], %s232_s20, %s232_s20, %s233_s21  }
   0x6   :  { %s234_s22 = smov [#allocation6]  }
   0x7   :  { %s30_s23 = sshll.u32 %s234_s22, 4  ;;  %s31_s23 = int_to_ptr.vmem [resolvable:$true] %s30_s23 }
   0x8   :  { %36 = dma.hbm_to_vmem [thread:$0]  %s29_s19, 2048, %s31_s23, [#allocation7], %s232_s20, %s232_s20, %s233_s21  }
   0x9   :  { %225 = dma.done.wait [#allocation4], 256  }
   0xa   :  { %226 = vsyncadd [#allocation4], 4294967040 }
   0xb   :  { %227 = dma.done.wait [#allocation7], 2048  }
   0xc   :  { %228 = vsyncadd [#allocation7], 4294965248  ;;  %v76_v0 = vld [vmem:[#allocation6 + $0x78] sm:$0xff]  ;;  %v75_v1 = vld [vmem:[#allocation6 + $0x70] sm:$0xff]  ;;  %s235_s24 = smov [#allocation8]   ;;  %s117_s28 = sshll.u32 %s280_s3, 4  ;;  %s118_s28 = int_to_ptr.hbm [resolvable:$true] %s117_s28 }
   0xd   :  { %77 = vmatpush.xpose.msra.mxu0 %v76_v0  ;;  %131 = vmatpush.xpose.msra.mxu1 %v76_v0  ;;  %v74_v2 = vld [vmem:[#allocation6 + $0x68] sm:$0xff]  ;;  %v73_v3 = vld [vmem:[#allocation6 + $0x60] sm:$0xff]  ;;  %v72_v4 = vld [vmem:[#allocation6 + $0x58] sm:$0xff]  ;;  %s115_s25 = sshll.u32 %s235_s24, 4  ;;  %s116_s25 = int_to_ptr.vmem [resolvable:$true] %s115_s25 }
   0xe   :  { %v71_v5 = vld [vmem:[#allocation6 + $0x50] sm:$0xff]  ;;  %v70_v6 = vld [vmem:[#allocation6 + $0x48] sm:$0xff]  ;;  %v69_v7 = vld [vmem:[#allocation6 + $0x40] sm:$0xff] }
   0xf   :  { %v68_v8 = vld [vmem:[#allocation6 + $0x38] sm:$0xff]  ;;  %v67_v9 = vld [vmem:[#allocation6 + $0x30] sm:$0xff]  ;;  %v66_v10 = vld [vmem:[#allocation6 + $0x28] sm:$0xff] }
  0x10   :  { %v65_v11 = vld [vmem:[#allocation6 + $0x20] sm:$0xff]  ;;  %v64_v12 = vld [vmem:[#allocation6 + $0x18] sm:$0xff]  ;;  %v63_v13 = vld [vmem:[#allocation6 + $0x10] sm:$0xff] }
  0x11   :  { %78 = vmatpush.xpose.msra.mxu0 %v75_v1  ;;  %132 = vmatpush.xpose.msra.mxu1 %v75_v1  ;;  %v62_v14 = vld [vmem:[#allocation6 + $0x8] sm:$0xff]  ;;  %v61_v15 = vld [vmem:[#allocation6] sm:$0xff]  ;;  %v59_v16 = vld [vmem:[#allocation3] sm:$0xff] }
  0x12   :  { %v60_v17 = vld [vmem:[#allocation3 + $0x8] sm:$0xff]  ;;  %v152_v18 = vld [vmem:[%s279_s2] ss:$0 sm:$0xff] }
  0x15   :  { %79 = vmatpush.xpose.msra.mxu0 %v74_v2  ;;  %133 = vmatpush.xpose.msra.mxu1 %v74_v2 }
  0x19   :  { %80 = vmatpush.xpose.msra.mxu0 %v73_v3  ;;  %134 = vmatpush.xpose.msra.mxu1 %v73_v3 }
  0x1d   :  { %81 = vmatpush.xpose.msra.mxu0 %v72_v4  ;;  %135 = vmatpush.xpose.msra.mxu1 %v72_v4 }
  0x21   :  { %82 = vmatpush.xpose.msra.mxu0 %v71_v5  ;;  %136 = vmatpush.xpose.msra.mxu1 %v71_v5 }
  0x25   :  { %83 = vmatpush.xpose.msra.mxu0 %v70_v6  ;;  %137 = vmatpush.xpose.msra.mxu1 %v70_v6 }
  0x29   :  { %84 = vmatpush.xpose.msra.mxu0 %v69_v7  ;;  %138 = vmatpush.xpose.msra.mxu1 %v69_v7 }
  0x2d   :  { %85 = vmatpush.xpose.msra.mxu0 %v68_v8  ;;  %139 = vmatpush.xpose.msra.mxu1 %v68_v8 }
  0x31   :  { %86 = vmatpush.xpose.msra.mxu0 %v67_v9  ;;  %140 = vmatpush.xpose.msra.mxu1 %v67_v9 }
  0x35   :  { %87 = vmatpush.xpose.msra.mxu0 %v66_v10  ;;  %141 = vmatpush.xpose.msra.mxu1 %v66_v10 }
  0x39   :  { %88 = vmatpush.xpose.msra.mxu0 %v65_v11  ;;  %142 = vmatpush.xpose.msra.mxu1 %v65_v11 }
  0x3d   :  { %89 = vmatpush.xpose.msra.mxu0 %v64_v12  ;;  %143 = vmatpush.xpose.msra.mxu1 %v64_v12 }
  0x41   :  { %90 = vmatpush.xpose.msra.mxu0 %v63_v13  ;;  %144 = vmatpush.xpose.msra.mxu1 %v63_v13 }
  0x45   :  { %91 = vmatpush.xpose.msra.mxu0 %v62_v14  ;;  %145 = vmatpush.xpose.msra.mxu1 %v62_v14 }
  0x49   :  { %92 = vmatpush.xpose.msra.mxu0 %v61_v15  ;;  %146 = vmatpush.xpose.msra.mxu1 %v61_v15 }
  0x4c   :  { %93 = vmatmul.f32.vlgmr.msra.gmra.mxu0 %v59_v16  ;;  %96 = vmatmul.f32.vlgmr.msra.gmra.mxu1 %v60_v17 }
  0xc9   :  { %v94_v19 = vpop.f32.mrf.mxu0  ;;  %v97_v20 = vpop.f32.mrf.mxu1 }
  0xca   :  { %v100_v21 = vadd.f32 %v152_v18, %v94_v19  ;;  %v101_v22 = vadd.f32 %v152_v18, %v97_v20 }
  0xcc   :  { %109 = vst [vmem:[#allocation8] sm:$0xff] %v100_v21 }
  0xcd   :  { %110 = vst [vmem:[#allocation8 + $0x8] sm:$0xff] %v101_v22 }
  0xce   :  { %123 = dma.vmem_to_hbm [thread:$0]  %s116_s25, 256, %s118_s28, [#allocation5], %s232_s20, %s232_s20, %s233_s21  }
  0xcf   :  { %229 = dma.done.wait [#allocation5], 256  }
  0xd0   :  { %230 = vsyncadd [#allocation5], 4294967040 }
  0xd1   :  { %128 = vsyncpa [#allocation4], 1 }
  0xd2   :  { %129 = vsyncpa [#allocation7], 1 }
  0xd3   :  { %130 = vsyncpa [#allocation5], 1 }

</bundles_post_ra>
